<compile_context>
chip_gen: v5e
topology: v5e:2x2
jax: 0.10.0
libtpu: 0.0.40
codegen_flags: <defaults>
</compile_context>

<pallas_src>
import functools
import math

import jax
import jax.numpy as jnp
import numpy as np
from jax.experimental import pallas as pl
from jax.experimental.pallas import tpu as pltpu


def _eca_kernel(x_ref, w_ref, o_ref, *, K: int):
    # x_ref: (Bt, C, HW) VMEM block  (Bt batch elements per grid step)
    # w_ref: (1, K)      SMEM conv weight (Conv1d(1,1,K) weight, read as scalars)
    Bt, C, HW = x_ref.shape
    pad = (K - 1) // 2

    # Global average pool over the flattened spatial axis (lane reduction),
    # accumulated in f32 even for low-precision inputs.
    m = jnp.mean(x_ref[...].astype(jnp.float32), axis=2, keepdims=True)   # (Bt, C, 1)

    # 1-D cross-correlation across the channel (sublane) axis with zero
    # padding, as K statically-unrolled shifted slices (K is tiny, e.g. 3).
    if pad > 0:
        zpad = jnp.zeros((Bt, pad, 1), jnp.float32)
        padded = jnp.concatenate([zpad, m, zpad], axis=1)                 # (Bt, C+2p, 1)
    else:
        padded = m
    acc = jnp.zeros((Bt, C, 1), jnp.float32)
    for t in range(K):                                                    # static unroll
        acc = acc + w_ref[0, t].astype(jnp.float32) * padded[:, t:t + C, :]

    # Sigmoid gate (f32 on the EUP), then broadcast-multiply with a fresh
    # VMEM read of the input tile; multiply/store in the input dtype.
    y = jax.nn.sigmoid(acc).astype(o_ref.dtype)                           # (Bt, C, 1)
    o_ref[...] = x_ref[...] * y                                           # (Bt, C, HW)


def _choose_batch_tile(B: int, per_batch_bytes: int,
                       target_bytes: int = 4 << 20) -> int:
    """Largest divisor of B whose block fits target_bytes; prefer >=2 grid steps."""
    divisors = [d for d in range(1, B + 1) if B % d == 0]
    fitting = [d for d in divisors if d * per_batch_bytes <= target_bytes]
    if not fitting:
        return 1
    bt = fitting[-1]
    # Keep >= 2 grid steps (both v7x TensorCores streaming) as long as blocks
    # stay >= ~1 MiB so per-step overhead remains amortized.
    if B // bt < 2:
        for d in reversed(fitting):
            if B // d >= 2 and d * per_batch_bytes >= (1 << 20):
                bt = d
                break
    return bt


def eca_block(x: jax.Array, weight: jax.Array) -> jax.Array:
    """x: (B, C, H, W), weight: (1, K) Conv1d(1,1,K,bias=False) weight."""
    B, C, H, W = x.shape
    K = weight.shape[-1]
    HW = H * W
    xf = x.reshape(B, C, HW)

    itemsize = x.dtype.itemsize
    per_batch_bytes = C * HW * itemsize
    bt = _choose_batch_tile(B, per_batch_bytes)
    grid = (B // bt,)

    cost = pl.CostEstimate(
        flops=2 * B * C * HW + 2 * B * C * K,       # pool adds + gate muls + conv madds
        transcendentals=B * C,                      # sigmoid
        bytes_accessed=2 * B * C * HW * itemsize + weight.size * weight.dtype.itemsize,
    )

    out = pl.pallas_call(
        functools.partial(_eca_kernel, K=K),
        out_shape=jax.ShapeDtypeStruct((B, C, HW), x.dtype),
        grid=grid,
        in_specs=[
            pl.BlockSpec((bt, C, HW), lambda b: (b, 0, 0)),          # multi-batch slab
            pl.BlockSpec(memory_space=pltpu.MemorySpace.SMEM),       # conv weight as SMEM scalars
        ],
        out_specs=pl.BlockSpec((bt, C, HW), lambda b: (b, 0, 0)),
        compiler_params=pltpu.CompilerParams(
            dimension_semantics=("parallel",),
            vmem_limit_bytes=64 << 20,
        ),
        cost_estimate=cost,
    )(xf, weight)
    return out.reshape(B, C, H, W)


def eca_ref(x: jax.Array, weight: jax.Array) -> jax.Array:
    """Pure-JAX reference mirroring the PyTorch forward."""
    B, C, H, W = x.shape
    K = weight.shape[-1]
    pad = (K - 1) // 2
    m = x.mean(axis=(2, 3))                               # (B, C)
    mp = jnp.pad(m, ((0, 0), (pad, pad)))
    conv = sum(weight[0, t] * mp[:, t:t + C] for t in range(K))
    y = jax.nn.sigmoid(conv)                              # (B, C)
    return x * y[:, :, None, None]


if __name__ == "__main__":
    # Module-implied sizes: channel=8 -> kernel_size = int(|(log2(8)+1)/2|) = 2 -> odd-adjust -> 3
    B, C, H, W = 2, 8, 16, 16
    b_param, gamma = 1, 2
    kernel_size = int(abs((math.log(C, 2) + b_param) / gamma))
    kernel_size = kernel_size if kernel_size % 2 else kernel_size + 1  # -> 3

    key = jax.random.PRNGKey(0)
    kx, kw = jax.random.split(key)
    x = jax.random.normal(kx, (B, C, H, W), dtype=jnp.float32)
    # Deterministic synthetic Conv1d(1, 1, K, bias=False) weight, shape (1, K).
    weight = jax.random.normal(kw, (1, kernel_size), dtype=jnp.float32) * 0.5

    out = jax.block_until_ready(eca_block(x, weight))

    ref = eca_ref(x, weight)
    np.testing.assert_allclose(np.asarray(out), np.asarray(ref), rtol=1e-5, atol=1e-5)

    print("KERNEL_OK")
</pallas_src>

<mosaic_0001>
module attributes {stable_mosaic.version = 11 : i64} {
  func.func @_eca_kernel(%arg0: i32, %arg1: memref<2x8x256xf32, #tpu.memory_space<vmem>>, %arg2: memref<1x3xf32, #tpu.memory_space<smem>>, %arg3: memref<2x8x256xf32, #tpu.memory_space<vmem>>) attributes {dimension_semantics = [#tpu.dimension_semantics<parallel>], iteration_bounds = array<i64: 1>, scalar_prefetch = 0 : i64, scratch_operands = 0 : i64, tpu.core_type = #tpu.core_type<tc>, window_params = [{transform_indices = @transform_0, window_bounds = array<i64: 2, 8, 256>}, {transform_indices = @transform_1, window_bounds = array<i64: 1, 3>}, {transform_indices = @transform_2, window_bounds = array<i64: 2, 8, 256>}]} {
    %c0 = arith.constant 0 : index
    %c0_0 = arith.constant 0 : index
    %c0_1 = arith.constant 0 : index
    %0 = vector.load %arg1[%c0, %c0_0, %c0_1] : memref<2x8x256xf32, #tpu.memory_space<vmem>>, vector<2x8x256xf32>
    %cst = arith.constant dense<0.000000e+00> : vector<2x8xf32>
    %1 = vector.multi_reduction <add>, %0, %cst [2] : vector<2x8x256xf32> to vector<2x8xf32>
    %2 = vector.shape_cast %1 : vector<2x8xf32> to vector<2x8x1xf32>
    %cst_2 = arith.constant 2.560000e+02 : f32
    %3 = vector.broadcast %cst_2 : f32 to vector<2x8x1xf32>
    %4 = arith.divf %2, %3 : vector<2x8x1xf32>
    %cst_3 = arith.constant 0.000000e+00 : f32
    %5 = vector.broadcast %cst_3 : f32 to vector<2x1x1xf32>
    %6 = tpu.concatenate %5, %4, %5 in 1 : vector<2x1x1xf32>, vector<2x8x1xf32>, vector<2x1x1xf32> -> vector<2x10x1xf32>
    %cst_4 = arith.constant 0.000000e+00 : f32
    %7 = vector.broadcast %cst_4 : f32 to vector<2x8x1xf32>
    %c0_5 = arith.constant 0 : index
    %c0_6 = arith.constant 0 : index
    %8 = memref.load %arg2[%c0_5, %c0_6] : memref<1x3xf32, #tpu.memory_space<smem>>
    %9 = vector.extract_strided_slice %6 {offsets = [0, 0, 0], sizes = [2, 8, 1], strides = [1, 1, 1]} : vector<2x10x1xf32> to vector<2x8x1xf32>
    %10 = vector.broadcast %8 : f32 to vector<2x8x1xf32>
    %11 = arith.mulf %10, %9 : vector<2x8x1xf32>
    %12 = arith.addf %7, %11 : vector<2x8x1xf32>
    %c0_7 = arith.constant 0 : index
    %c1 = arith.constant 1 : index
    %13 = memref.load %arg2[%c0_7, %c1] : memref<1x3xf32, #tpu.memory_space<smem>>
    %14 = vector.extract_strided_slice %6 {offsets = [0, 1, 0], sizes = [2, 8, 1], strides = [1, 1, 1]} : vector<2x10x1xf32> to vector<2x8x1xf32>
    %15 = vector.broadcast %13 : f32 to vector<2x8x1xf32>
    %16 = arith.mulf %15, %14 : vector<2x8x1xf32>
    %17 = arith.addf %12, %16 : vector<2x8x1xf32>
    %c0_8 = arith.constant 0 : index
    %c2 = arith.constant 2 : index
    %18 = memref.load %arg2[%c0_8, %c2] : memref<1x3xf32, #tpu.memory_space<smem>>
    %19 = vector.extract_strided_slice %6 {offsets = [0, 2, 0], sizes = [2, 8, 1], strides = [1, 1, 1]} : vector<2x10x1xf32> to vector<2x8x1xf32>
    %20 = vector.broadcast %18 : f32 to vector<2x8x1xf32>
    %21 = arith.mulf %20, %19 : vector<2x8x1xf32>
    %22 = arith.addf %17, %21 : vector<2x8x1xf32>
    %23 = arith.negf %22 : vector<2x8x1xf32>
    %24 = math.exp %23 : vector<2x8x1xf32>
    %cst_9 = arith.constant 1.000000e+00 : f32
    %25 = vector.broadcast %cst_9 : f32 to vector<2x8x1xf32>
    %26 = arith.addf %25, %24 : vector<2x8x1xf32>
    %27 = arith.divf %25, %26 : vector<2x8x1xf32>
    %c0_10 = arith.constant 0 : index
    %c0_11 = arith.constant 0 : index
    %c0_12 = arith.constant 0 : index
    %28 = vector.load %arg1[%c0_10, %c0_11, %c0_12] : memref<2x8x256xf32, #tpu.memory_space<vmem>>, vector<2x8x256xf32>
    %29 = vector.broadcast %27 : vector<2x8x1xf32> to vector<2x8x256xf32>
    %30 = arith.mulf %28, %29 : vector<2x8x256xf32>
    %c0_13 = arith.constant 0 : index
    %c0_14 = arith.constant 0 : index
    %c0_15 = arith.constant 0 : index
    %31 = vector.load %arg3[%c0_13, %c0_14, %c0_15] : memref<2x8x256xf32, #tpu.memory_space<vmem>>, vector<2x8x256xf32>
    tpu.vector_store %arg3[%c0_13, %c0_14, %c0_15], %30 {strides = array<i32>} : memref<2x8x256xf32, #tpu.memory_space<vmem>>, vector<2x8x256xf32>,
    return
  }
  func.func @transform_0(%arg0: i32) -> (i32, i32, i32) {
    %c0_i32 = arith.constant 0 : i32
    %c0_i32_0 = arith.constant 0 : i32
    %c0_i32_1 = arith.constant 0 : i32
    return %arg0, %c0_i32, %c0_i32_0 : i32, i32, i32
  }
  func.func @transform_1(%arg0: i32) -> (i32, i32) {
    %c0_i32 = arith.constant 0 : i32
    %c0_i32_0 = arith.constant 0 : i32
    %c0_i32_1 = arith.constant 0 : i32
    return %c0_i32, %c0_i32_0 : i32, i32
  }
  func.func @transform_2(%arg0: i32) -> (i32, i32, i32) {
    %c0_i32 = arith.constant 0 : i32
    %c0_i32_0 = arith.constant 0 : i32
    %c0_i32_1 = arith.constant 0 : i32
    return %arg0, %c0_i32, %c0_i32_0 : i32, i32, i32
  }
}

</mosaic_0001>

<bundles_post_ra>
// kernel: tpu_custom_call.1
= control target key start
LH: loop header
LB: loop body
LE: loop exit
PB: predicated region body
PF: predicated region fallthrough
CT: control target
= control target key end

     0   :  { %7 = vsyncpa [#allocation3], 0  ;;  %s348_s0 = inlined_call_operand.hbm [shape: f32[2,8,256], index: 0, kind: input, shape index: {}]   ;;  %s349_s1 = inlined_call_operand.hbm [shape: f32[1,3], index: 1, kind: input, shape index: {}]   ;;  %s350_s2 = inlined_call_operand.hbm [shape: f32[2,8,256], index: 2, kind: output, shape index: {}]  }
   0x1   :  { %8 = vsyncpa [#allocation5], 0 }
   0x2   :  { %9 = vsyncpa [#allocation4], 0  ;;  %s14_s11 = sshll.u32 %s348_s0, 4  ;;  %s284_s12 = smov [#allocation2]   ;;  %s15_s11 = int_to_ptr.hbm [resolvable:$true] %s14_s11 }
   0x3   :  { %s16_s13 = sshll.u32 %s284_s12, 4  ;;  %s28_s16 = sshll.u32 %s349_s1, 4  ;;  %s17_s13 = int_to_ptr.vmem [resolvable:$true] %s16_s13  ;;  %s29_s16 = int_to_ptr.hbm [resolvable:$true] %s28_s16 }
   0x4   :  { %s285_s17 = smov 256   ;;  %s286_s18 = smov 16  }
   0x5   :  { %22 = dma.hbm_to_vmem [thread:$0]  %s15_s11, 512, %s17_s13, [#allocation3], %s285_s17, %s285_s17, %s286_s18  }
   0x6   :  { %s287_s19 = smov [#allocation6]  }
   0x7   :  { %31 = dma.hbm_to_smem %s29_s16, 16, %s287_s19, [#allocation5]  }
   0x8   :  { %278 = dma.done.wait [#allocation3], 512  }
   0x9   :  { %279 = vsyncadd [#allocation3], 4294966784 }
   0xa   :  { %280 = dma.done.wait [#allocation5], 16  }
   0xb   :  { %281 = vsyncadd [#allocation5], 4294967280 }
   0xc   :  { %40 = sfence }
   0xd   :  { %v315_v0 = vld [vmem:[#allocation2] sm:$0xff]  ;;  %v317_v1 = vld [vmem:[#allocation2 + $0x8] sm:$0xff]  ;;  %v321_v3 = vld [vmem:[#allocation2 + $0x10] sm:$0xff]  ;;  %v288_v6 = vmov 256.0   ;;  %s195_s0 = sld [smem:[#allocation6 + $0x1]]  ;;  %vm66_vm1 = vcmask 1040384  }
   0xe   :  { %v45_v2 = vadd.f32 %v317_v1, %v315_v0  ;;  %v323_v4 = vld [vmem:[#allocation2 + $0x18] sm:$0xff]  ;;  %208 = vrcp.f32 %v288_v6  ;;  %s196_s1 = sld [smem:[#allocation6 + $0x2]]  ;;  %v289_v18 = vmov 0   ;;  %vm87_vm2 = vcmask 1046528   ;;  %s290_s21 = smov [#allocation7]  }
   0xf   :  { %v48_v5 = vadd.f32 %v323_v4, %v321_v3  ;;  %s327_s20 = sld [smem:[#allocation6]]  ;;  %206 = vset.pattern.permute.xlu1 %v289_v18  ;;  %207 = vset.pattern.permute.xlu0 %v289_v18  ;;  %vm108_vm3 = vcmask 1045504   ;;  %s179_s22 = sshll.u32 %s290_s21, 4  ;;  %s180_s22 = int_to_ptr.vmem [resolvable:$true] %s179_s22 }
  0x10   :  { %46 = vadd.xlane.f32.xlu0 %v45_v2  ;;  %s181_s25 = sshll.u32 %s350_s2, 4  ;;  %s182_s25 = int_to_ptr.hbm [resolvable:$true] %s181_s25 }
  0x13   :  { %v78_v15 = vstv %s195_s0 }
  0x14   :  { %v209_v7 = vpop.eup %208  ;;  %v99_v16 = vstv %s196_s1 }
  0x15   :  { %v52_v8 = vmul.f32 256.0, %v209_v7  ;;  %vm56_vm0 = vweird.f32 %v209_v7  ;;  %v72_v21 = vstv %s327_s20 }
  0x17   :  { %v53_v9 = vsub.f32 1.0, %v52_v8 }
  0x18   :  { %49 = vadd.xlane.f32.xlu0 %v48_v5 }
  0x19   :  { %v54_v10 = vmul.f32 %v209_v7, %v53_v9 }
  0x1b   :  { %v55_v11 = vadd.f32 %v209_v7, %v54_v10 }
  0x1d   :  { %v57_v12 = vsel %vm56_vm0, %v209_v7, %v55_v11 }
  0x83   :  { %v47_v13 = vpop.xlane.xlu0 %46 }
  0x84   :  { %v58_v14 = vmul.f32 %v57_v12, %v47_v13 }
  0x86   :  { %v62_v17 = vrot.slane %v58_v14, 7 }
  0x88   :  { %v67_v19 = vsel %vm66_vm1, 0.0, %v62_v17  ;;  %v69_v20 = vsel %vm66_vm1, %v62_v17, 0.0 }
  0x89   :  { %v79_v22 = vmul.f32 %v78_v15, %v67_v19  ;;  %v80_v23 = vmul.f32 %v78_v15, %v69_v20  ;;  %v100_v24 = vmul.f32 %v99_v16, %v67_v19  ;;  %v101_v25 = vmul.f32 %v99_v16, %v69_v20 }
  0x8a   :  { %v73_v30 = vmul.f32 %v72_v21, %v67_v19 }
  0x8b   :  { %v88_v26 = vrot.slane %v79_v22, 1  ;;  %v89_v27 = vrot.slane %v80_v23, 1  ;;  %v109_v28 = vrot.slane %v100_v24, 2  ;;  %v50_v29 = vpop.xlane.xlu0 %49  ;;  %v110_v31 = vrot.slane %v101_v25, 2 }
  0x8c   :  { %v59_v32 = vmul.f32 %v57_v12, %v50_v29 }
  0x8d   :  { %v90_v33 = vsel %vm87_vm2, %v88_v26, %v89_v27  ;;  %v111_v36 = vsel %vm108_vm3, %v109_v28, %v110_v31 }
  0x8e   :  { %v96_v34 = vadd.f32 %v90_v33, %v73_v30  ;;  %v63_v35 = vrot.slane %v59_v32, 7 }
  0x90   :  { %v117_v37 = vadd.f32 %v111_v36, %v96_v34  ;;  %v68_v38 = vsel %vm66_vm1, 0.0, %v63_v35  ;;  %v70_v39 = vsel %vm66_vm1, %v63_v35, 0.0 }
  0x91   :  { %v81_v40 = vmul.f32 %v78_v15, %v68_v38  ;;  %v82_v41 = vmul.f32 %v78_v15, %v70_v39  ;;  %v102_v42 = vmul.f32 %v99_v16, %v68_v38  ;;  %v103_v44 = vmul.f32 %v99_v16, %v70_v39 }
  0x92   :  { %v197_v43 = vmul.f32 -1.442695, %v117_v37  ;;  %v74_v48 = vmul.f32 %v72_v21, %v68_v38 }
  0x93   :  { %v91_v45 = vrot.slane %v81_v40, 1  ;;  %v92_v46 = vrot.slane %v82_v41, 1  ;;  %v112_v47 = vrot.slane %v102_v42, 2  ;;  %v113_v49 = vrot.slane %v103_v44, 2 }
  0x94   :  { %210 = vpow2.f32 %v197_v43 }
  0x95   :  { %v93_v50 = vsel %vm87_vm2, %v91_v45, %v92_v46  ;;  %v114_v52 = vsel %vm108_vm3, %v112_v47, %v113_v49 }
  0x96   :  { %v97_v51 = vadd.f32 %v93_v50, %v74_v48 }
  0x98   :  { %v118_v53 = vadd.f32 %v114_v52, %v97_v51 }
  0x9a   :  { %v211_v54 = vpop.eup %210  ;;  %v198_v55 = vmul.f32 -1.442695, %v118_v53 }
  0x9b   :  { %v125_v56 = vadd.f32 1.0, %v211_v54 }
  0x9c   :  { %212 = vpow2.f32 %v198_v55 }
  0x9d   :  { %214 = vrcp.f32 %v125_v56  ;;  %v138_v62 = vand.u32 2147483648, %v125_v56  ;;  %v136_v2 = vand.u32 2147483647, %v125_v56  ;;  %vm132_vm5 = vweird.f32 %v125_v56 }
  0x9f   :  { %v139_v7 = vor.u32 1.1754944e-38, %v138_v62  ;;  %vm137_vm7 = vcmp.eq.f32.partialorder %v136_v2, 8.507059e+37 }
  0xa2   :  { %v213_v57 = vpop.eup %212 }
  0xa3   :  { %v215_v58 = vpop.eup %214  ;;  %v126_v59 = vadd.f32 1.0, %v213_v57 }
  0xa4   :  { %v128_v60 = vmul.f32 %v215_v58, %v125_v56  ;;  %vm133_vm4 = vweird.f32 %v215_v58 }
  0xa5   :  { %216 = vrcp.f32 %v126_v59  ;;  %vm134_vm6 = vmor %vm132_vm5, %vm133_vm4  ;;  %v153_v12 = vand.u32 2147483648, %v126_v59  ;;  %v151_v14 = vand.u32 2147483647, %v126_v59  ;;  %vm147_vm9 = vweird.f32 %v126_v59 }
  0xa6   :  { %v129_v61 = vsub.f32 1.0, %v128_v60 }
  0xa7   :  { %v154_v16 = vor.u32 1.1754944e-38, %v153_v12  ;;  %vm152_vm11 = vcmp.eq.f32.partialorder %v151_v14, 8.507059e+37 }
  0xa8   :  { %v130_v63 = vmul.f32 %v215_v58, %v129_v61 }
  0xaa   :  { %v131_v5 = vadd.f32 %v215_v58, %v130_v63 }
  0xab   :  { %v217_v6 = vpop.eup %216 }
  0xac   :  { %v135_v8 = vsel %vm134_vm6, %v215_v58, %v131_v5  ;;  %v143_v9 = vmul.f32 %v217_v6, %v126_v59  ;;  %vm148_vm8 = vweird.f32 %v217_v6 }
  0xad   :  { %v140_v10 = vsel %vm137_vm7, %v139_v7, %v135_v8  ;;  %vm149_vm10 = vmor %vm147_vm9, %vm148_vm8 }
  0xae   :  { %159 = vperm.xlu1 %206, %v140_v10   ;;  %v144_v11 = vsub.f32 1.0, %v143_v9 }
  0xb0   :  { %v145_v13 = vmul.f32 %v217_v6, %v144_v11 }
  0xb2   :  { %v146_v15 = vadd.f32 %v217_v6, %v145_v13 }
  0xb4   :  { %v150_v17 = vsel %vm149_vm10, %v217_v6, %v146_v15 }
  0xb5   :  { %v155_v18 = vsel %vm152_vm11, %v154_v16, %v150_v17 }
  0xb6   :  { %164 = vperm.xlu1 %206, %v155_v18  }
 0x120   :  { %v160_v19 = vpop.permute.xlu1 %159 }
 0x121   :  { %v167_v20 = vmul.f32 %v160_v19, %v315_v0  ;;  %v168_v21 = vmul.f32 %v160_v19, %v317_v1 }
 0x123   :  { %171 = vst [vmem:[#allocation7] sm:$0xff] %v167_v20 }
 0x124   :  { %172 = vst [vmem:[#allocation7 + $0x8] sm:$0xff] %v168_v21 }
 0x128   :  { %v165_v22 = vpop.permute.xlu1 %164 }
 0x129   :  { %v169_v23 = vmul.f32 %v165_v22, %v321_v3  ;;  %v170_v24 = vmul.f32 %v165_v22, %v323_v4 }
 0x12b   :  { %173 = vst [vmem:[#allocation7 + $0x10] sm:$0xff] %v169_v23 }
 0x12c   :  { %174 = vst [vmem:[#allocation7 + $0x18] sm:$0xff] %v170_v24 }
 0x12d   :  { %187 = dma.vmem_to_hbm [thread:$0]  %s180_s22, 512, %s182_s25, [#allocation4], %s285_s17, %s285_s17, %s286_s18  }
 0x12e   :  { %282 = dma.done.wait [#allocation4], 512  }
 0x12f   :  { %283 = vsyncadd [#allocation4], 4294966784 }
 0x130   :  { %192 = vsyncpa [#allocation3], 1 }
 0x131   :  { %193 = vsyncpa [#allocation4], 1 }
 0x132   :  { %194 = vsyncpa [#allocation5], 1 }

</bundles_post_ra>
